<compile_context>
chip_gen: v7x
topology: tpu7x:2x2x1
jax: 0.10.0
libtpu: 0.0.40
codegen_flags: <defaults>
</compile_context>

<pallas_src>
import jax
import jax.numpy as jnp
from jax.experimental import pallas as pl
from jax.experimental.pallas import tpu as pltpu

LANE = 128
MIB = 1024 * 1024


# ----------------------------------------------------------------------------- kernel
def _make_kernel(defer_lane_reduce: bool):
    """Grid = (batch_tiles, spatial_tiles); spatial axis is a reduction.

    x_ref   : (bm, C, ts)   bf16 activation tile, ts % 128 == 0
    wc_ref  : (C, E)        pre-composed (branch + first head Linear), 1/HW folded in
    bc_ref  : (1, E)
    wh2_ref : (E, NP)       second head Linear, zero-padded to NP = 128 lanes
    bh2_ref : (1, NP)
    o_ref   : (bm, NP)
    feat_acc: (bm, C, 128)  f32 accumulator (deferred cross-lane reduce), or (bm, C)
    """

    def kernel(x_ref, wc_ref, bc_ref, wh2_ref, bh2_ref, o_ref, feat_acc):
        s = pl.program_id(1)

        @pl.when(s == 0)
        def _init():
            feat_acc[...] = jnp.zeros_like(feat_acc)

        nchunks = x_ref.shape[-1] // LANE
        if defer_lane_reduce:
            # Pure-VALU per-step adds on 128-lane chunks; the single cross-lane
            # (XLU) reduce is deferred to the finalize branch.
            for j in range(nchunks):
                feat_acc[...] += x_ref[:, :, j * LANE:(j + 1) * LANE].astype(jnp.float32)
        else:
            for j in range(nchunks):
                feat_acc[...] += jnp.sum(
                    x_ref[:, :, j * LANE:(j + 1) * LANE].astype(jnp.float32), axis=-1)

        @pl.when(s == pl.num_programs(1) - 1)
        def _finalize():
            feat = feat_acc[...]
            if defer_lane_reduce:
                feat = jnp.sum(feat, axis=-1)                    # (bm, C), one XLU reduce
            # mean-pool (1/HW folded into Wc) + pre-composed Linear(2000,256)
            h = jnp.dot(feat, wc_ref[...],
                        preferred_element_type=jnp.float32) + bc_ref[...]
            h = jnp.maximum(h, 0.0)                              # ReLU (f32, VPU)
            o_ref[...] = (jnp.dot(h, wh2_ref[...], preferred_element_type=jnp.float32)
                          + bh2_ref[...]).astype(o_ref.dtype)

    return kernel


# ----------------------------------------------------------------------------- params
def init_params(key, in_channels, branch_dim=1000, embedding=256, num_classes=6):
    """Parameters in the original module's structure (branch proxies + MLP head)."""
    ks = jax.random.split(key, 5)
    s = 0.02
    return {
        # TODO(synk): deterministic Linear proxies for van_base / Swin 1000-way logits.
        "w1": s * jax.random.normal(ks[0], (in_channels, branch_dim), jnp.float32),
        "b1": jnp.zeros((1, branch_dim), jnp.float32),
        "w2": s * jax.random.normal(ks[1], (in_channels, branch_dim), jnp.float32),
        "b2": jnp.zeros((1, branch_dim), jnp.float32),
        # head: Linear(2*branch_dim, embedding) -> ReLU -> Linear(embedding, num_classes)
        "wh1": s * jax.random.normal(ks[2], (2 * branch_dim, embedding), jnp.float32),
        "bh1": s * jax.random.normal(ks[3], (1, embedding), jnp.float32),
        "wh2": s * jax.random.normal(ks[4], (embedding, num_classes), jnp.float32),
        "bh2": jnp.zeros((1, num_classes), jnp.float32),
    }


def precompose_params(params, spatial_size, lane=LANE):
    """One-time weight prep (NOT per call).

    concat([x1, x2], 1) @ Wh1 == x1 @ Wh1[:bd] + x2 @ Wh1[bd:], and with the linear
    branch proxies x_i = mean_hw(x) @ w_i + b_i the whole pre-ReLU chain collapses to
    mean_hw(x) @ Wc + bc.  The 1/HW of the mean pool is folded into Wc.
    num_classes is zero-padded up to a multiple of 128 lanes (exact; sliced outside).
    """
    bd = params["w1"].shape[1]
    wh1a, wh1b = params["wh1"][:bd], params["wh1"][bd:]
    wc = (params["w1"] @ wh1a + params["w2"] @ wh1b) / float(spatial_size)   # (C, E)
    bc = params["b1"] @ wh1a + params["b2"] @ wh1b + params["bh1"]           # (1, E)

    nc = params["wh2"].shape[1]
    ncp = ((nc + lane - 1) // lane) * lane
    wh2p = jnp.zeros((params["wh2"].shape[0], ncp), jnp.float32).at[:, :nc].set(params["wh2"])
    bh2p = jnp.zeros((1, ncp), jnp.float32).at[:, :nc].set(params["bh2"])
    return {"wc": wc, "bc": bc, "wh2": wh2p, "bh2": bh2p, "num_classes": nc}


# ----------------------------------------------------------------------------- planning
def _round_up(x, m):
    return ((x + m - 1) // m) * m


def _vmem_capacity_bytes():
    try:
        cap = getattr(pltpu.get_tpu_info(), "vmem_capacity_bytes", None)
        if cap:
            return int(cap)
    except Exception:
        pass
    return 64 * MIB   # conservative default (v7x per-TensorCore VMEM)


def _plan(B_pad, C, hw, E, NP, vmem_cap):
    """VMEM-budget-aware tile plan.  Returns (bm, ts, hw_pad, defer, vmem_limit)."""
    act_bytes = 2                                       # bf16 activation stream
    budget = min(vmem_cap, 128 * MIB) // 2              # headroom for compiler scratch
    w_fixed = 2 * 4 * (C * E + E + E * NP + NP)         # double-buffered weights/biases

    # batch tile: multiple of 8 dividing B_pad, capped at 128; >= 2 tiles whenever
    # B allows so the "parallel" axis shards across v7x's two TensorCores.
    cands = [d for d in range(8, min(B_pad, 128) + 1, 8) if B_pad % d == 0] or [B_pad]
    cands.sort(reverse=True)
    if B_pad >= 16 and any(B_pad // d >= 2 for d in cands):
        cands = [d for d in cands if B_pad // d >= 2]
    bm = cands[-1]
    for d in cands:                                      # largest bm whose minimal tile fits
        if w_fixed + 2 * 4 * d * NP + 2 * d * C * LANE * act_bytes <= budget:
            bm = d
            break

    # deferred cross-lane reduce only if the wide accumulator stays cheap
    defer = bm * C * LANE * 4 <= min(4 * MIB, budget // 8)
    acc_bytes = bm * C * (LANE if defer else 1) * 4

    # spatial tile: largest multiple of 128 that divides the 128-padded HW and keeps
    # the double-buffered activation under the remaining budget (cap 2048: the HBM
    # roofline saturates around 512-1024; bigger tiles buy nothing).
    hw_pad = _round_up(hw, LANE)
    avail = budget - w_fixed - 2 * 4 * bm * NP - acc_bytes
    ts_cap = max(LANE, min(2048, (avail // (2 * bm * C * act_bytes)) // LANE * LANE))
    n128 = hw_pad // LANE
    k = 1
    for cand in range(min(ts_cap // LANE, n128), 0, -1):
        if n128 % cand == 0:
            k = cand
            break
    ts = LANE * k                                        # single grid step if hw_pad fits

    est = w_fixed + 2 * 4 * bm * NP + acc_bytes + 2 * bm * C * ts * act_bytes
    vmem_limit = int(min(vmem_cap, max(32 * MIB, est + 8 * MIB)))
    return bm, ts, hw_pad, defer, vmem_limit


# ----------------------------------------------------------------------------- wrapper
def get_net_forward(x, kparams):
    B, C, H, W = x.shape
    hw = H * W

    wc, bc, wh2, bh2 = kparams["wc"], kparams["bc"], kparams["wh2"], kparams["bh2"]
    num_classes = int(kparams["num_classes"])
    E = wc.shape[1]
    NP = wh2.shape[1]

    B_pad = _round_up(B, 8)                              # sublane-aligned batch
    bm, ts, hw_pad, defer, vmem_limit = _plan(B_pad, C, hw, E, NP, _vmem_capacity_bytes())

    # bf16 HBM stream; zero-pad batch/spatial (exact: zeros don't change the sum,
    # and 1/HW of the *original* spatial size is already folded into Wc).
    x3 = x.reshape(B, C, hw).astype(jnp.bfloat16)
    if B_pad != B or hw_pad != hw:
        x3 = jnp.pad(x3, ((0, B_pad - B), (0, 0), (0, hw_pad - hw)))

    grid = (B_pad // bm, hw_pad // ts)
    acc_shape = (bm, C, LANE) if defer else (bm, C)

    flops = B_pad * C * hw_pad + 2 * B_pad * C * E + 2 * B_pad * E * NP
    bytes_accessed = (2 * B_pad * C * hw_pad
                      + 4 * (C * E + E + E * NP + NP)
                      + 4 * B_pad * NP)

    out_padded = pl.pallas_call(
        _make_kernel(defer),
        out_shape=jax.ShapeDtypeStruct((B_pad, NP), jnp.float32),
        grid_spec=pltpu.PrefetchScalarGridSpec(
            num_scalar_prefetch=0,
            grid=grid,
            in_specs=[
                pl.BlockSpec((bm, C, ts), lambda b, s: (b, 0, s)),   # activation tiles
                pl.BlockSpec((C, E), lambda b, s: (0, 0)),           # weights: constant
                pl.BlockSpec((1, E), lambda b, s: (0, 0)),           #   block index ->
                pl.BlockSpec((E, NP), lambda b, s: (0, 0)),          #   VMEM-resident
                pl.BlockSpec((1, NP), lambda b, s: (0, 0)),
            ],
            out_specs=pl.BlockSpec((bm, NP), lambda b, s: (b, 0)),
            scratch_shapes=[pltpu.VMEM(acc_shape, jnp.float32)],
        ),
        compiler_params=pltpu.CompilerParams(
            dimension_semantics=("parallel", "arbitrary"),
            vmem_limit_bytes=vmem_limit,
        ),
        cost_estimate=pl.CostEstimate(
            flops=int(flops), transcendentals=0, bytes_accessed=int(bytes_accessed)),
    )(x3, wc, bc, wh2, bh2)

    return out_padded[:B, :num_classes]          # lane-dense kernel output, slice outside


# ----------------------------------------------------------------------------- main
if __name__ == "__main__":
    key = jax.random.PRNGKey(0)
    k_x, k_p = jax.random.split(key)

    # Small deterministic input: batch=2, channels=4, spatial=16x16 (NCHW).
    B, C, H, W = 2, 4, 16, 16
    x = jax.random.normal(k_x, (B, C, H, W), dtype=jnp.float32)
    params = init_params(k_p, in_channels=C, branch_dim=1000,
                         embedding=256, num_classes=6)
    kparams = precompose_params(params, spatial_size=H * W)     # one-time weight prep

    out = get_net_forward(x, kparams)
    out = jax.block_until_ready(out)
    assert out.shape == (B, 6), out.shape

    # Sanity check against a plain-JAX f32 reference of the original (un-composed)
    # computation.  The kernel streams the activation in bf16, hence the mixed-
    # precision tolerance.
    feat = jnp.mean(x.reshape(B, C, -1), axis=-1)
    x1 = feat @ params["w1"] + params["b1"]
    x2 = feat @ params["w2"] + params["b2"]
    y = jnp.concatenate([x1, x2], axis=1)
    h = jnp.maximum(y @ params["wh1"] + params["bh1"], 0.0)
    ref = h @ params["wh2"] + params["bh2"]
    assert jnp.allclose(out, ref, atol=2e-3, rtol=2e-3), \
        float(jnp.max(jnp.abs(out - ref)))

    print("KERNEL_OK")
</pallas_src>

<mosaic_0001>
module attributes {stable_mosaic.version = 11 : i64} {
  func.func @kernel(%arg0: i32, %arg1: i32, %arg2: memref<8x4x256xbf16, #tpu.memory_space<vmem>>, %arg3: memref<4x256xf32, #tpu.memory_space<vmem>>, %arg4: memref<1x256xf32, #tpu.memory_space<vmem>>, %arg5: memref<256x128xf32, #tpu.memory_space<vmem>>, %arg6: memref<1x128xf32, #tpu.memory_space<vmem>>, %arg7: memref<8x128xf32, #tpu.memory_space<vmem>>, %arg8: memref<8x4x128xf32, #tpu.memory_space<vmem>>) attributes {dimension_semantics = [#tpu.dimension_semantics<parallel>, #tpu.dimension_semantics<arbitrary>], iteration_bounds = array<i64: 1, 1>, scalar_prefetch = 0 : i64, scratch_operands = 1 : i64, tpu.core_type = #tpu.core_type<tc>, window_params = [{transform_indices = @transform_0, window_bounds = array<i64: 8, 4, 256>}, {pipeline_mode = #tpu.pipeline_mode<synchronous>, transform_indices = @transform_1, window_bounds = array<i64: 4, 256>}, {pipeline_mode = #tpu.pipeline_mode<synchronous>, transform_indices = @transform_2, window_bounds = array<i64: 1, 256>}, {pipeline_mode = #tpu.pipeline_mode<synchronous>, transform_indices = @transform_3, window_bounds = array<i64: 256, 128>}, {pipeline_mode = #tpu.pipeline_mode<synchronous>, transform_indices = @transform_4, window_bounds = array<i64: 1, 128>}, {transform_indices = @transform_5, window_bounds = array<i64: 8, 128>}]} {
    %c0_i32 = arith.constant 0 : i32
    %0 = arith.cmpi eq, %arg1, %c0_i32 : i32
    %1 = arith.extui %0 : i1 to i32
    %c0_i32_0 = arith.constant 0 : i32
    %2 = arith.cmpi ne, %1, %c0_i32_0 : i32
    scf.if %2 {
      %cst = arith.constant 0.000000e+00 : f32
      %16 = vector.broadcast %cst : f32 to vector<8x4x128xf32>
      %c0_19 = arith.constant 0 : index
      %c0_20 = arith.constant 0 : index
      %c0_21 = arith.constant 0 : index
      %17 = vector.load %arg8[%c0_19, %c0_20, %c0_21] : memref<8x4x128xf32, #tpu.memory_space<vmem>>, vector<8x4x128xf32>
      tpu.vector_store %arg8[%c0_19, %c0_20, %c0_21], %16 {strides = array<i32>} : memref<8x4x128xf32, #tpu.memory_space<vmem>>, vector<8x4x128xf32>,
    } else {
    }
    %c0 = arith.constant 0 : index
    %c0_1 = arith.constant 0 : index
    %c0_2 = arith.constant 0 : index
    %3 = vector.load %arg8[%c0, %c0_1, %c0_2] : memref<8x4x128xf32, #tpu.memory_space<vmem>>, vector<8x4x128xf32>
    %c0_3 = arith.constant 0 : index
    %c0_4 = arith.constant 0 : index
    %c0_5 = arith.constant 0 : index
    %4 = vector.load %arg2[%c0_3, %c0_4, %c0_5] : memref<8x4x256xbf16, #tpu.memory_space<vmem>>, vector<8x4x128xbf16>
    %5 = arith.extf %4 : vector<8x4x128xbf16> to vector<8x4x128xf32>
    %6 = arith.addf %3, %5 : vector<8x4x128xf32>
    %c0_6 = arith.constant 0 : index
    %c0_7 = arith.constant 0 : index
    %c0_8 = arith.constant 0 : index
    %7 = vector.load %arg8[%c0_6, %c0_7, %c0_8] : memref<8x4x128xf32, #tpu.memory_space<vmem>>, vector<8x4x128xf32>
    tpu.vector_store %arg8[%c0_6, %c0_7, %c0_8], %6 {strides = array<i32>} : memref<8x4x128xf32, #tpu.memory_space<vmem>>, vector<8x4x128xf32>,
    %c0_9 = arith.constant 0 : index
    %c0_10 = arith.constant 0 : index
    %c0_11 = arith.constant 0 : index
    %8 = vector.load %arg8[%c0_9, %c0_10, %c0_11] : memref<8x4x128xf32, #tpu.memory_space<vmem>>, vector<8x4x128xf32>
    %c0_12 = arith.constant 0 : index
    %c0_13 = arith.constant 0 : index
    %c128 = arith.constant 128 : index
    %9 = vector.load %arg2[%c0_12, %c0_13, %c128] : memref<8x4x256xbf16, #tpu.memory_space<vmem>>, vector<8x4x128xbf16>
    %10 = arith.extf %9 : vector<8x4x128xbf16> to vector<8x4x128xf32>
    %11 = arith.addf %8, %10 : vector<8x4x128xf32>
    %c0_14 = arith.constant 0 : index
    %c0_15 = arith.constant 0 : index
    %c0_16 = arith.constant 0 : index
    %12 = vector.load %arg8[%c0_14, %c0_15, %c0_16] : memref<8x4x128xf32, #tpu.memory_space<vmem>>, vector<8x4x128xf32>
    tpu.vector_store %arg8[%c0_14, %c0_15, %c0_16], %11 {strides = array<i32>} : memref<8x4x128xf32, #tpu.memory_space<vmem>>, vector<8x4x128xf32>,
    %c0_i32_17 = arith.constant 0 : i32
    %13 = arith.cmpi eq, %arg1, %c0_i32_17 : i32
    %14 = arith.extui %13 : i1 to i32
    %c0_i32_18 = arith.constant 0 : i32
    %15 = arith.cmpi ne, %14, %c0_i32_18 : i32
    scf.if %15 {
      %c0_19 = arith.constant 0 : index
      %c0_20 = arith.constant 0 : index
      %c0_21 = arith.constant 0 : index
      %16 = vector.load %arg8[%c0_19, %c0_20, %c0_21] : memref<8x4x128xf32, #tpu.memory_space<vmem>>, vector<8x4x128xf32>
      %cst = arith.constant dense<0.000000e+00> : vector<8x4xf32>
      %17 = vector.multi_reduction <add>, %16, %cst [2] : vector<8x4x128xf32> to vector<8x4xf32>
      %c0_22 = arith.constant 0 : index
      %c0_23 = arith.constant 0 : index
      %18 = vector.load %arg3[%c0_22, %c0_23] : memref<4x256xf32, #tpu.memory_space<vmem>>, vector<4x256xf32>
      %cst_24 = arith.constant dense<0.000000e+00> : vector<8x256xf32>
      %19 = tpu.matmul %17, %18, %cst_24 {dimension_numbers = #tpu.dot_dimension_numbers<[1], [0], [0], [1], [0, 0, 1, 1], [], []>} : vector<8x4xf32>, vector<4x256xf32>, vector<8x256xf32> -> vector<8x256xf32>
      %c0_25 = arith.constant 0 : index
      %c0_26 = arith.constant 0 : index
      %20 = vector.load %arg4[%c0_25, %c0_26] : memref<1x256xf32, #tpu.memory_space<vmem>>, vector<1x256xf32>
      %21 = vector.broadcast %20 : vector<1x256xf32> to vector<8x256xf32>
      %22 = arith.addf %19, %21 : vector<8x256xf32>
      %cst_27 = arith.constant 0.000000e+00 : f32
      %23 = vector.broadcast %cst_27 : f32 to vector<8x256xf32>
      %24 = arith.maximumf %22, %23 : vector<8x256xf32>
      %c0_28 = arith.constant 0 : index
      %c0_29 = arith.constant 0 : index
      %25 = vector.load %arg5[%c0_28, %c0_29] : memref<256x128xf32, #tpu.memory_space<vmem>>, vector<256x128xf32>
      %cst_30 = arith.constant dense<0.000000e+00> : vector<8x128xf32>
      %26 = tpu.matmul %24, %25, %cst_30 {dimension_numbers = #tpu.dot_dimension_numbers<[1], [0], [0], [1], [0, 0, 1, 1], [], []>} : vector<8x256xf32>, vector<256x128xf32>, vector<8x128xf32> -> vector<8x128xf32>
      %c0_31 = arith.constant 0 : index
      %c0_32 = arith.constant 0 : index
      %27 = vector.load %arg6[%c0_31, %c0_32] : memref<1x128xf32, #tpu.memory_space<vmem>>, vector<1x128xf32>
      %28 = vector.broadcast %27 : vector<1x128xf32> to vector<8x128xf32>
      %29 = arith.addf %26, %28 : vector<8x128xf32>
      %c0_33 = arith.constant 0 : index
      %c0_34 = arith.constant 0 : index
      %30 = vector.load %arg7[%c0_33, %c0_34] : memref<8x128xf32, #tpu.memory_space<vmem>>, vector<8x128xf32>
      tpu.vector_store %arg7[%c0_33, %c0_34], %29 {strides = array<i32>} : memref<8x128xf32, #tpu.memory_space<vmem>>, vector<8x128xf32>,
    } else {
    }
    return
  }
  func.func @transform_0(%arg0: i32, %arg1: i32) -> (i32, i32, i32) {
    %c0_i32 = arith.constant 0 : i32
    %c0_i32_0 = arith.constant 0 : i32
    return %arg0, %c0_i32, %arg1 : i32, i32, i32
  }
  func.func @transform_1(%arg0: i32, %arg1: i32) -> (i32, i32) {
    %c0_i32 = arith.constant 0 : i32
    %c0_i32_0 = arith.constant 0 : i32
    %c0_i32_1 = arith.constant 0 : i32
    return %c0_i32, %c0_i32_0 : i32, i32
  }
  func.func @transform_2(%arg0: i32, %arg1: i32) -> (i32, i32) {
    %c0_i32 = arith.constant 0 : i32
    %c0_i32_0 = arith.constant 0 : i32
    %c0_i32_1 = arith.constant 0 : i32
    return %c0_i32, %c0_i32_0 : i32, i32
  }
  func.func @transform_3(%arg0: i32, %arg1: i32) -> (i32, i32) {
    %c0_i32 = arith.constant 0 : i32
    %c0_i32_0 = arith.constant 0 : i32
    %c0_i32_1 = arith.constant 0 : i32
    return %c0_i32, %c0_i32_0 : i32, i32
  }
  func.func @transform_4(%arg0: i32, %arg1: i32) -> (i32, i32) {
    %c0_i32 = arith.constant 0 : i32
    %c0_i32_0 = arith.constant 0 : i32
    %c0_i32_1 = arith.constant 0 : i32
    return %c0_i32, %c0_i32_0 : i32, i32
  }
  func.func @transform_5(%arg0: i32, %arg1: i32) -> (i32, i32) {
    %c0_i32 = arith.constant 0 : i32
    %c0_i32_0 = arith.constant 0 : i32
    return %arg0, %c0_i32 : i32, i32
  }
}

</mosaic_0001>

<bundles_post_ra>
// kernel: tpu_custom_call.1
= control target key start
LH: loop header
LB: loop body
LE: loop exit
PB: predicated region body
PF: predicated region fallthrough
CT: control target
= control target key end

     0   :  { %10 = vsyncpa [#allocation4], 0  ;;  %s750_s0 = inlined_call_operand.hbm [shape: bf16[8,4,256], index: 0, kind: input, shape index: {}]   ;;  %s751_s1 = inlined_call_operand.hbm [shape: f32[4,256], index: 1, kind: input, shape index: {}]   ;;  %s752_s2 = inlined_call_operand.vmem [shape: f32[1,256], index: 2, kind: input, shape index: {}]   ;;  %s753_s3 = inlined_call_operand.hbm [shape: f32[256,128], index: 3, kind: input, shape index: {}]   ;;  %s754_s4 = inlined_call_operand.vmem [shape: f32[1,128], index: 4, kind: input, shape index: {}]   ;;  %s755_s5 = inlined_call_operand.hbm [shape: f32[8,128], index: 5, kind: output, shape index: {}]  }
   0x1   :  { %11 = vsyncpa [#allocation7], 0 }
   0x2   :  { %12 = vsyncpa [#allocation5], 0  ;;  %s640_s18 = smov [#allocation6]   ;;  %s641_s20 = smov [#allocation3]  }
   0x3   :  { %s31_s19 = sshll.u32 %s640_s18, 4  ;;  %s18_s21 = sshll.u32 %s641_s20, 4  ;;  %s32_s19 = int_to_ptr.vmem [resolvable:$true] %s31_s19  ;;  %s679_s21 = int_to_ptr.vmem [resolvable:$true] %s18_s21 }
   0x4   :  { %s546_s24 = scalar_lea.hbm %s751_s1, 128 }
   0x5   :  { %p547_p0 = scmp.ne.s32.totalorder %s751_s1, %s546_s24  ;;  %p550_p1 = scmp.lt.u32.totalorder %s546_s24, %s751_s1 }
   0x7   :  { %p552_p2 = pnand %p550_p1, %p547_p0 }
   0x9   :  { %555 = shalt.err (!%p552_p2)
}
   0xa   :  { %s556_s29 = scalar_lea.vmem %s32_s19, 128  ;;  %p561_p4 = scmp.lt.s32.totalorder %s32_s19, %s32_s19 }
   0xb   :  { %p557_p3 = scmp.ne.s32.totalorder %s32_s19, %s556_s29  ;;  %p562_p5 = scmp.lt.s32.totalorder %s556_s29, %s556_s29 }
   0xd   :  { %p563_p6 = por %p562_p5, %p561_p4 }
   0xf   :  { %p564_p7 = pnand %p563_p6, %p557_p3 }
  0x11   :  { %567 = shalt.err (!%p564_p7)
}
  0x12   :  { %34 = dma.hbm_to_vmem [thread:$0]  %s751_s1, 128, %s32_s19, [#allocation7]  }
  0x13   :  { %s568_s9 = scalar_lea.hbm %s750_s0, 512 }
  0x14   :  { %p569_p8 = scmp.ne.s32.totalorder %s750_s0, %s568_s9  ;;  %p572_p9 = scmp.lt.u32.totalorder %s568_s9, %s750_s0 }
  0x16   :  { %p574_p10 = pnand %p572_p9, %p569_p8 }
  0x18   :  { %577 = shalt.err (!%p574_p10)
}
  0x19   :  { %s578_s14 = scalar_lea.vmem %s679_s21, 512  ;;  %p583_p12 = scmp.lt.s32.totalorder %s679_s21, %s679_s21 }
  0x1a   :  { %p579_p11 = scmp.ne.s32.totalorder %s679_s21, %s578_s14  ;;  %p584_p13 = scmp.lt.s32.totalorder %s578_s14, %s578_s14 }
  0x1c   :  { %p585_p0 = por %p584_p13, %p583_p12 }
  0x1e   :  { %p586_p1 = pnand %p585_p0, %p579_p11 }
  0x20   :  { %589 = shalt.err (!%p586_p1)
}
  0x21   :  { %s642_s1 = smov 64   ;;  %s643_s15 = smov 4  }
  0x22   :  { %24 = dma.hbm_to_vmem [thread:$0]  %s750_s0, 512, %s679_s21, [#allocation4], %s642_s1, %s642_s1, %s643_s15  }
  0x23   :  { %s644_s18 = smov [#allocation8]   ;;  %s590_s23 = scalar_lea.hbm %s753_s3, 4096 }
  0x24   :  { %s42_s19 = sshll.u32 %s644_s18, 4  ;;  %p591_p2 = scmp.ne.s32.totalorder %s753_s3, %s590_s23  ;;  %s43_s19 = int_to_ptr.vmem [resolvable:$true] %s42_s19 }
  0x25   :  { %p594_p3 = scmp.lt.u32.totalorder %s590_s23, %s753_s3 }
  0x27   :  { %p596_p4 = pnand %p594_p3, %p591_p2 }
  0x29   :  { %599 = shalt.err (!%p596_p4)
}
  0x2a   :  { %s600_s28 = scalar_lea.vmem %s43_s19, 4096  ;;  %p605_p6 = scmp.lt.s32.totalorder %s43_s19, %s43_s19 }
  0x2b   :  { %p601_p5 = scmp.ne.s32.totalorder %s43_s19, %s600_s28  ;;  %p606_p7 = scmp.lt.s32.totalorder %s600_s28, %s600_s28 }
  0x2d   :  { %p607_p8 = por %p606_p7, %p605_p6 }
  0x2f   :  { %p608_p9 = pnand %p607_p8, %p601_p5 }
  0x31   :  { %611 = shalt.err (!%p608_p9)
}
  0x32   :  { %s645_s0 = smov 128   ;;  %s646_s21 = smov 8  }
  0x33   :  { %48 = dma.hbm_to_vmem [thread:$0]  %s753_s3, 4096, %s43_s19, [#allocation7], %s645_s0, %s645_s0, %s646_s21  }
  0x34   :  { %634 = dma.done.wait [#allocation4], 512  }
  0x35   :  { %635 = vsyncadd [#allocation4], 4294966784 }
  0x36   :  { %636 = dma.done.wait [#allocation7], 4224  }
  0x37   :  { %637 = vsyncadd [#allocation7], 4294963072  ;;  %v647_v0 = vmov 0.0   ;;  %v80_v1 = vld [vmem:[#allocation3] sm:$0x3]  ;;  %vm163_vm0 = vcmask 1043456  }
  0x38   :  { %64 = vst [vmem:[#allocation2] sm:$0xf] %v647_v0  ;;  %65 = vst [vmem:[#allocation2 + $0x4] sm:$0xf] %v647_v0  ;;  %330 = vmatprep.mubr.f32.mxu0 %v647_v0  ;;  %v82_v2 = vld [vmem:[#allocation3 + $0x8] sm:$0x3]  ;;  %v88_v4 = vunpack.c.l.bf16 %v80_v1 }
  0x39   :  { %66 = vst [vmem:[#allocation2 + $0x8] sm:$0xf] %v647_v0  ;;  %67 = vst [vmem:[#allocation2 + $0xc] sm:$0xf] %v647_v0  ;;  %v90_v6 = vunpack.c.l.bf16 %v82_v2  ;;  %v81_v8 = vld [vmem:[#allocation3 + $0x4] sm:$0x3] }
  0x3a   :  { %68 = vst [vmem:[#allocation2 + $0x10] sm:$0xf] %v647_v0  ;;  %69 = vst [vmem:[#allocation2 + $0x14] sm:$0xf] %v647_v0  ;;  %v89_v11 = vunpack.c.l.bf16 %v81_v8  ;;  %v83_v13 = vld [vmem:[#allocation3 + $0xc] sm:$0x3] }
  0x3b   :  { %70 = vst [vmem:[#allocation2 + $0x18] sm:$0xf] %v647_v0  ;;  %71 = vst [vmem:[#allocation2 + $0x1c] sm:$0xf] %v647_v0  ;;  %v91_v14 = vunpack.c.l.bf16 %v83_v13  ;;  %v84_v16 = vld [vmem:[#allocation3 + $0x10] sm:$0x3] }
  0x3c   :  { %v120_v17 = vld [vmem:[#allocation3 + $0x2] sm:$0x3]  ;;  %v92_v19 = vunpack.c.l.bf16 %v84_v16  ;;  %v85_v21 = vld [vmem:[#allocation3 + $0x14] sm:$0x3]  ;;  %v122_v22 = vld [vmem:[#allocation3 + $0xa] sm:$0x3] }
  0x3d   :  { %v93_v24 = vunpack.c.l.bf16 %v85_v21  ;;  %v86_v26 = vld [vmem:[#allocation3 + $0x18] sm:$0x3]  ;;  %v87_v30 = vld [vmem:[#allocation3 + $0x1c] sm:$0x3]  ;;  %v121_v31 = vld [vmem:[#allocation3 + $0x6] sm:$0x3]  ;;  %v128_v34 = vunpack.c.l.bf16 %v120_v17  ;;  %v130_v35 = vunpack.c.l.bf16 %v122_v22 }
  0x3e   :  { %v94_v28 = vunpack.c.l.bf16 %v86_v26  ;;  %v95_v33 = vunpack.c.l.bf16 %v87_v30  ;;  %v123_v36 = vld [vmem:[#allocation3 + $0xe] sm:$0x3]  ;;  %v124_v38 = vld [vmem:[#allocation3 + $0x12] sm:$0x3]  ;;  %v129_v40 = vunpack.c.l.bf16 %v121_v31  ;;  %v125_v41 = vld [vmem:[#allocation3 + $0x16] sm:$0x3] }
  0x3f   :  { %v72_v3 = vld [vmem:[#allocation2] sm:$0xf]  ;;  %v73_v7 = vld [vmem:[#allocation2 + $0x4] sm:$0xf]  ;;  %v131_v44 = vunpack.c.l.bf16 %v123_v36  ;;  %v126_v45 = vld [vmem:[#allocation3 + $0x1a] sm:$0x3]  ;;  %v132_v48 = vunpack.c.l.bf16 %v124_v38  ;;  %v133_v51 = vunpack.c.l.bf16 %v125_v41 }
  0x40   :  { %v74_v5 = vld [vmem:[#allocation2 + $0x8] sm:$0xf]  ;;  %v96_v9 = vadd.f32 %v88_v4, %v72_v3  ;;  %v75_v12 = vld [vmem:[#allocation2 + $0xc] sm:$0xf]  ;;  %v97_v18 = vadd.f32 %v89_v11, %v73_v7  ;;  %v127_v49 = vld [vmem:[#allocation3 + $0x1e] sm:$0x3]  ;;  %v134_v54 = vunpack.c.l.bf16 %v126_v45 }
  0x41   :  { %v98_v10 = vadd.f32 %v90_v6, %v74_v5  ;;  %v76_v15 = vld [vmem:[#allocation2 + $0x10] sm:$0xf]  ;;  %v77_v20 = vld [vmem:[#allocation2 + $0x14] sm:$0xf]  ;;  %v99_v23 = vadd.f32 %v91_v14, %v75_v12  ;;  %v135_v57 = vunpack.c.l.bf16 %v127_v49  ;;  %v188_v17 = vld [vmem:[#allocation6] sm:$0xff]  ;;  %vm243_vm1 = vcmask 1041409  }
  0x42   :  { %104 = vst [vmem:[#allocation2] sm:$0xf] %v96_v9  ;;  %v78_v25 = vld [vmem:[#allocation2 + $0x18] sm:$0xf]  ;;  %105 = vst [vmem:[#allocation2 + $0x4] sm:$0xf] %v97_v18  ;;  %v100_v27 = vadd.f32 %v92_v19, %v76_v15  ;;  %v101_v32 = vadd.f32 %v93_v24, %v77_v20  ;;  %v258_v18 = vcombine.high %v188_v17, %v188_v17 }
  0x43   :  { %106 = vst [vmem:[#allocation2 + $0x8] sm:$0xf] %v98_v10  ;;  %v79_v29 = vld [vmem:[#allocation2 + $0x1c] sm:$0xf]  ;;  %107 = vst [vmem:[#allocation2 + $0xc] sm:$0xf] %v99_v23  ;;  %v102_v37 = vadd.f32 %v94_v28, %v78_v25 }
  0x44   :  { %108 = vst [vmem:[#allocation2 + $0x10] sm:$0xf] %v100_v27  ;;  %109 = vst [vmem:[#allocation2 + $0x14] sm:$0xf] %v101_v32  ;;  %v103_v39 = vadd.f32 %v95_v33, %v79_v29  ;;  %465 = vmatprep.subr.msk.mxu0 %vm163_vm0, %v258_v18  ;;  %v355_v19 = vld [vmem:[#allocation8 + $0x80] sm:$0xff]  ;;  %v356_v20 = vld [vmem:[#allocation8 + $0x88] sm:$0xff] }
  0x45   :  { %110 = vst [vmem:[#allocation2 + $0x18] sm:$0xf] %v102_v37  ;;  %466 = vmatpush1.msk.msra.mxu0 %vm163_vm0, %v188_v17  ;;  %v339_v21 = vld [vmem:[#allocation8] sm:$0xff]  ;;  %v504_v22 = vpack.c.bf16 %v356_v20, %v355_v19  ;;  %v340_v23 = vld [vmem:[#allocation8 + $0x8] sm:$0xff]  ;;  %v357_v24 = vld [vmem:[#allocation8 + $0x90] sm:$0xff]  ;;  %vm245_vm2 = vcmask 1042434  }
  0x46   :  { %111 = vst [vmem:[#allocation2 + $0x1c] sm:$0xf] %v103_v39  ;;  %v358_v25 = vld [vmem:[#allocation8 + $0x98] sm:$0xff]  ;;  %v506_v26 = vpack.c.bf16 %v340_v23, %v339_v21  ;;  %v341_v28 = vld [vmem:[#allocation8 + $0x10] sm:$0xff]  ;;  %v359_v30 = vld [vmem:[#allocation8 + $0xa0] sm:$0xff]  ;;  %vm247_vm3 = vcmask 1043459  }
  0x47   :  { %v508_v27 = vpack.c.bf16 %v358_v25, %v357_v24  ;;  %v342_v29 = vld [vmem:[#allocation8 + $0x18] sm:$0xff]  ;;  %505 = vmatprep.subr.bf16.mxu1 %v504_v22  ;;  %v360_v31 = vld [vmem:[#allocation8 + $0xa8] sm:$0xff]  ;;  %v361_v36 = vld [vmem:[#allocation8 + $0xb0] sm:$0xff]  ;;  %vm249_vm4 = vcmask 1044484   ;;  %vm251_vm5 = vcmask 1045509   ;;  %vm253_vm6 = vcmask 1046534  }
  0x48   :  { %507 = vmatpush3.bf16.msra.mxu1 %v506_v26  ;;  %v510_v32 = vpack.c.bf16 %v342_v29, %v341_v28  ;;  %v512_v33 = vpack.c.bf16 %v360_v31, %v359_v30  ;;  %v362_v37 = vld [vmem:[#allocation8 + $0xb8] sm:$0xff]  ;;  %vm255_vm7 = vcmask 1047559   ;;  %vm259_vm8 = vcmask 31744   ;;  %v351_v21 = vld [vmem:[#allocation8 + $0x60] sm:$0xff]  ;;  %v352_v22 = vld [vmem:[#allocation8 + $0x68] sm:$0xff]  ;;  %s648_s9 = smov [#allocation9]  }
  0x49   :  { %v112_v42 = vld [vmem:[#allocation2] sm:$0xf]  ;;  %v113_v50 = vld [vmem:[#allocation2 + $0x4] sm:$0xf]  ;;  %509 = vmatprep.subr.bf16.mxu1 %v508_v27  ;;  %v516_v39 = vpack.c.bf16 %v362_v37, %v361_v36  ;;  %v530_v23 = vpack.c.bf16 %v352_v22, %v351_v21  ;;  %v369_v24 = vld [vmem:[#allocation8 + $0xf0] sm:$0xff]  ;;  %s455_s10 = sshll.u32 %s648_s9, 4  ;;  %s456_s10 = int_to_ptr.vmem [resolvable:$true] %s455_s10 }
  0x4a   :  { %v114_v43 = vld [vmem:[#allocation2 + $0x8] sm:$0xf]  ;;  %v136_v46 = vadd.f32 %v128_v34, %v112_v42  ;;  %v137_v52 = vadd.f32 %v129_v40, %v113_v50  ;;  %v115_v53 = vld [vmem:[#allocation2 + $0xc] sm:$0xf]  ;;  %v345_v40 = vld [vmem:[#allocation8 + $0x30] sm:$0xff]  ;;  %p617_p11 = scmp.lt.s32.totalorder %s456_s10, %s456_s10 }
  0x4b   :  { %v138_v47 = vadd.f32 %v130_v35, %v114_v43  ;;  %v139_v55 = vadd.f32 %v131_v44, %v115_v53  ;;  %v116_v56 = vld [vmem:[#allocation2 + $0x10] sm:$0xf]  ;;  %v117_v59 = vld [vmem:[#allocation2 + $0x14] sm:$0xf]  ;;  %v343_v34 = vld [vmem:[#allocation8 + $0x20] sm:$0xff] }
  0x4c   :  { %144 = vst [vmem:[#allocation2] sm:$0xf] %v136_v46  ;;  %145 = vst [vmem:[#allocation2 + $0x4] sm:$0xf] %v137_v52  ;;  %v140_v58 = vadd.f32 %v132_v48, %v116_v56  ;;  %v141_v60 = vadd.f32 %v133_v51, %v117_v59  ;;  %v118_v61 = vld [vmem:[#allocation2 + $0x18] sm:$0xf]  ;;  %511 = vmatpush3.bf16.msra.mxu1 %v510_v32 }
  0x4d   :  { %146 = vst [vmem:[#allocation2 + $0x8] sm:$0xf] %v138_v47  ;;  %147 = vst [vmem:[#allocation2 + $0xc] sm:$0xf] %v139_v55  ;;  %v142_v62 = vadd.f32 %v134_v54, %v118_v61  ;;  %v119_v63 = vld [vmem:[#allocation2 + $0x1c] sm:$0xf]  ;;  %513 = vmatprep.subr.bf16.mxu1 %v512_v33 }
  0x4e   :  { %148 = vst [vmem:[#allocation2 + $0x10] sm:$0xf] %v140_v58  ;;  %149 = vst [vmem:[#allocation2 + $0x14] sm:$0xf] %v141_v60  ;;  %v143_v0 = vadd.f32 %v135_v57, %v119_v63  ;;  %v344_v35 = vld [vmem:[#allocation8 + $0x28] sm:$0xff]  ;;  %v346_v41 = vld [vmem:[#allocation8 + $0x38] sm:$0xff]  ;;  %v191_v58 = vlaneseq }
  0x4f   :  { %150 = vst [vmem:[#allocation2 + $0x18] sm:$0xf] %v142_v62  ;;  %v514_v38 = vpack.c.bf16 %v344_v35, %v343_v34  ;;  %v363_v42 = vld [vmem:[#allocation8 + $0xc0] sm:$0xff]  ;;  %v364_v43 = vld [vmem:[#allocation8 + $0xc8] sm:$0xff]  ;;  %v518_v44 = vpack.c.bf16 %v346_v41, %v345_v40  ;;  %v365_v48 = vld [vmem:[#allocation8 + $0xd0] sm:$0xff] }
  0x50   :  { %151 = vst [vmem:[#allocation2 + $0x1c] sm:$0xf] %v143_v0  ;;  %v520_v45 = vpack.c.bf16 %v364_v43, %v363_v42  ;;  %v347_v46 = vld [vmem:[#allocation8 + $0x40] sm:$0xff]  ;;  %v348_v47 = vld [vmem:[#allocation8 + $0x48] sm:$0xff]  ;;  %v366_v49 = vld [vmem:[#allocation8 + $0xd8] sm:$0xff]  ;;  %v192_v59 = vshrl.u32 %v191_v58, 7 }
  0x51   :  { %515 = vmatpush3.bf16.msra.mxu1 %v514_v38  ;;  %v522_v50 = vpack.c.bf16 %v348_v47, %v347_v46  ;;  %v524_v51 = vpack.c.bf16 %v366_v49, %v365_v48  ;;  %v349_v52 = vld [vmem:[#allocation8 + $0x50] sm:$0xff]  ;;  %v350_v53 = vld [vmem:[#allocation8 + $0x58] sm:$0xff]  ;;  %v367_v54 = vld [vmem:[#allocation8 + $0xe0] sm:$0xff]  ;;  %v210_v60 = vand.u32 127, %v191_v58 }
  0x52   :  { %517 = vmatprep.subr.bf16.mxu1 %v516_v39  ;;  %v368_v55 = vld [vmem:[#allocation8 + $0xe8] sm:$0xff]  ;;  %v526_v56 = vpack.c.bf16 %v350_v53, %v349_v52  ;;  %v370_v25 = vld [vmem:[#allocation8 + $0xf8] sm:$0xff]  ;;  %v353_v27 = vld [vmem:[#allocation8 + $0x70] sm:$0xff]  ;;  %v193_v30 = vsub.s32 0, %v192_v59  ;;  %v197_v32 = vsub.s32 1, %v192_v59 }
  0x53   :  { %v155_v1 = vld [vmem:[#allocation2] sm:$0xf]  ;;  %v156_v5 = vld [vmem:[#allocation2 + $0x4] sm:$0xf]  ;;  %v528_v57 = vpack.c.bf16 %v368_v55, %v367_v54  ;;  %v213_v63 = vsub.s32 %v210_v60, %v192_v59  ;;  %v532_v26 = vpack.c.bf16 %v370_v25, %v369_v24 }
  0x54   :  { %v157_v2 = vld [vmem:[#allocation2 + $0x8] sm:$0xf]  ;;  %v164_v3 = vsel %vm163_vm0, %v155_v1, 0.0  ;;  %v167_v6 = vsel %vm163_vm0, %v156_v5, 0.0  ;;  %v158_v7 = vld [vmem:[#allocation2 + $0xc] sm:$0xf] }
  0x55   :  { %v170_v4 = vsel %vm163_vm0, %v157_v2, 0.0  ;;  %165 = vadd.xlane.f32.xlu0 %v164_v3  ;;  %v173_v8 = vsel %vm163_vm0, %v158_v7, 0.0  ;;  %v159_v9 = vld [vmem:[#allocation2 + $0x10] sm:$0xf]  ;;  %v160_v10 = vld [vmem:[#allocation2 + $0x14] sm:$0xf]  ;;  %519 = vmatpush3.bf16.msra.mxu1 %v518_v44 }
  0x56   :  { %171 = vadd.xlane.f32.xlu1 %v170_v4  ;;  %v176_v11 = vsel %vm163_vm0, %v159_v9, 0.0  ;;  %v179_v12 = vsel %vm163_vm0, %v160_v10, 0.0  ;;  %v161_v13 = vld [vmem:[#allocation2 + $0x18] sm:$0xf]  ;;  %521 = vmatprep.subr.bf16.mxu1 %v520_v45  ;;  %v354_v28 = vld [vmem:[#allocation8 + $0x78] sm:$0xff] }
  0x57   :  { %v162_v14 = vld [vmem:[#allocation2 + $0x1c] sm:$0xf]  ;;  %v182_v15 = vsel %vm163_vm0, %v161_v13, 0.0  ;;  %v534_v29 = vpack.c.bf16 %v354_v28, %v353_v27  ;;  %v189_v31 = vld [vmem:[%s752_s2] sm:$0x3]  ;;  %s612_s2 = scalar_lea.vmem %s456_s10, 128 }
  0x58   :  { %v185_v16 = vsel %vm163_vm0, %v162_v14, 0.0  ;;  %v194_v33 = vrot.slane %v189_v31, %v193_v30  ;;  %v198_v34 = vrot.slane %v189_v31, %v197_v32  ;;  %v468_v42 = vld [vmem:[%s754_s4] ss:$0 sm:$0xff]  ;;  %p613_p10 = scmp.ne.s32.totalorder %s456_s10, %s612_s2  ;;  %p618_p12 = scmp.lt.s32.totalorder %s612_s2, %s612_s2 }
  0x59   :  { %168 = vadd.xlane.f32.xlu0 %v167_v6  ;;  %523 = vmatpush3.bf16.msra.mxu1 %v522_v50 }
  0x5a   :  { %174 = vadd.xlane.f32.xlu1 %v173_v8  ;;  %525 = vmatprep.subr.bf16.mxu1 %v524_v51  ;;  %p619_p13 = por %p618_p12, %p617_p11 }
  0x5c   :  { %p620_p0 = pnand %p619_p13, %p613_p10 }
  0x5d   :  { %177 = vadd.xlane.f32.xlu0 %v176_v11  ;;  %527 = vmatpush3.bf16.msra.mxu1 %v526_v56 }
  0x5e   :  { %180 = vadd.xlane.f32.xlu1 %v179_v12  ;;  %529 = vmatprep.subr.bf16.mxu1 %v528_v57 }
  0x61   :  { %183 = vadd.xlane.f32.xlu0 %v182_v15  ;;  %531 = vmatpush3.bf16.msra.mxu1 %v530_v23 }
  0x62   :  { %186 = vadd.xlane.f32.xlu1 %v185_v16  ;;  %533 = vmatprep.subr.bf16.mxu1 %v532_v26 }
  0x65   :  { %535 = vmatpush3.bf16.msra.mxu1 %v534_v29 }
  0xe2   :  { %v166_v61 = vpop.xlane.xlu0 %165 }
  0xe3   :  { %v172_v62 = vpop.xlane.xlu1 %171  ;;  %v214_v2 = vrot.slane %v166_v61, %v213_v63 }
  0xe4   :  { %v222_v5 = vrot.slane %v172_v62, %v213_v63 }
  0xe6   :  { %v169_v0 = vpop.xlane.xlu0 %168 }
  0xe7   :  { %v175_v1 = vpop.xlane.xlu1 %174  ;;  %v218_v3 = vrot.slane %v169_v0, %v213_v63 }
  0xe8   :  { %v226_v4 = vrot.slane %v175_v1, %v213_v63 }
  0xe9   :  { %v244_v6 = vsel %vm243_vm1, %v218_v3, %v214_v2 }
  0xea   :  { %v246_v7 = vsel %vm245_vm2, %v222_v5, %v244_v6  ;;  %v178_v8 = vpop.xlane.xlu0 %177 }
  0xeb   :  { %v181_v9 = vpop.xlane.xlu1 %180  ;;  %v248_v10 = vsel %vm247_vm3, %v226_v4, %v246_v7  ;;  %v230_v11 = vrot.slane %v178_v8, %v213_v63 }
  0xec   :  { %v234_v12 = vrot.slane %v181_v9, %v213_v63 }
  0xed   :  { %v250_v13 = vsel %vm249_vm4, %v230_v11, %v248_v10 }
  0xee   :  { %v184_v14 = vpop.xlane.xlu0 %183  ;;  %v252_v18 = vsel %vm251_vm5, %v234_v12, %v250_v13 }
  0xef   :  { %v187_v15 = vpop.xlane.xlu1 %186  ;;  %v238_v16 = vrot.slane %v184_v14, %v213_v63 }
  0xf0   :  { %v242_v17 = vrot.slane %v187_v15, %v213_v63 }
  0xf1   :  { %v254_v19 = vsel %vm253_vm6, %v238_v16, %v252_v18 }
  0xf2   :  { %v256_v20 = vsel %vm255_vm7, %v242_v17, %v254_v19 }
  0xf3   :  { %467 = vmatmul.mubr.msk.f32.vlgmr.msra.gmra.mrb[0].mxu0 %vm259_vm8, %v256_v20 }
 0x1c6   :  { %v332_v35 = vpop.f32.mrb[0].mxu0 }
 0x1c7   :  { %v333_v36 = vadd.f32 %v332_v35, %v194_v33  ;;  %v334_v37 = vpop.f32.mrb[1].mxu0 }
 0x1c8   :  { %v335_v38 = vadd.f32 %v334_v37, %v198_v34 }
 0x1c9   :  { %v337_v40 = vmax.f32 %v333_v36, 0.0 }
 0x1ca   :  { %v338_v39 = vmax.f32 %v335_v38, 0.0 }
 0x1cc   :  { %442 = vmatprep.mubr.f32.mxu1 %v338_v39 }
 0x1cd   :  { %443 = vmatmul.mubr.f32.vlgmr.msra.gmra.mrb[0].mxu1 %v337_v40 }
 0x2a0   :  { %v501_v41 = vpop.f32.mrb[0].mxu1 }
 0x2a1   :  { %v502_v43 = vpop.f32.mrb[1].mxu1 }
 0x2a2   :  { %v503_v44 = vadd.f32 %v502_v43, %v501_v41 }
 0x2a4   :  { %v445_v45 = vadd.f32 %v503_v44, %v468_v42 }
 0x2a6   :  { %448 = vst [vmem:[#allocation9] sm:$0xff] %v445_v45 }
 0x2a7   :  { %623 = shalt.err (!%p620_p0)
}
 0x2a8   :  { %s624_s13 = scalar_lea.hbm %s755_s5, 128 }
 0x2a9   :  { %p625_p1 = scmp.ne.s32.totalorder %s755_s5, %s624_s13  ;;  %p628_p2 = scmp.lt.u32.totalorder %s624_s13, %s755_s5 }
 0x2ab   :  { %p630_p3 = pnand %p628_p2, %p625_p1 }
 0x2ad   :  { %633 = shalt.err (!%p630_p3)
}
 0x2ae   :  { %458 = dma.vmem_to_hbm [thread:$0]  %s456_s10, 128, %s755_s5, [#allocation5]  }
 0x2af   :  { %638 = dma.done.wait [#allocation5], 128  }
 0x2b0   :  { %639 = vsyncadd [#allocation5], 4294967168 }
 0x2b1   :  { %462 = vsyncpa [#allocation4], 1 }
 0x2b2   :  { %463 = vsyncpa [#allocation7], 1 }
 0x2b3   :  { %464 = vsyncpa [#allocation5], 1 }

</bundles_post_ra>
